<compile_context>
chip_gen: v6e
topology: v6e:2x2x1
jax: 0.10.0
libtpu: 0.0.40
codegen_flags: <defaults>
</compile_context>

<pallas_src>
import functools

import jax
import jax.numpy as jnp
from jax.experimental import pallas as pl
from jax.experimental.pallas import tpu as pltpu


def _softpool_kernel(x_ref, pwt_ref, o_ref, *, kh, sh, toh):
    # x_ref  : (C, bH, W)     one batch element, one tile of input rows
    #                         (batch dim squeezed out by the BlockSpec)
    # pwt_ref: (W, oW)        binary column-pooling matrix (transposed)
    # o_ref  : (C, toh, oW)
    C = x_ref.shape[0]
    W = x_ref.shape[2]
    oW = pwt_ref.shape[1]

    # ---- H-direction pooling fused with exp / channel-sum (EUP + VPU) ----
    # Output row t pools input rows t*sh + r for r in [0, kh).  Each phase r is
    # one (strided) sublane load; for k == s every input row's exp is computed
    # exactly once.  Pure-slice indexers only (no scalar index mixed in).
    num_rows = None   # pool_h(x * e_x)  : (C, toh, W) f32
    den_rows = None   # pool_h(e_x)      : (1, toh, W) f32
    for r in range(kh):
        idx = pl.ds(r, toh) if sh == 1 else pl.ds(r, toh, stride=sh)
        x_r = x_ref[:, idx, :].astype(jnp.float32)              # (C, toh, W)
        e_r = jnp.sum(jnp.exp(x_r), axis=0, keepdims=True)      # (1, toh, W)
        n_r = x_r * e_r
        num_rows = n_r if num_rows is None else num_rows + n_r
        den_rows = e_r if den_rows is None else den_rows + e_r

    # ---- W-direction pooling: one collapsed matmul on the MXU ----
    pwt = pwt_ref[...]
    if toh % 8 == 0:
        # layout-free reshape: collapse C into the M dimension of the matmul
        num = jnp.dot(num_rows.reshape(C * toh, W), pwt,
                      preferred_element_type=jnp.float32).reshape(C, toh, oW)
    else:
        num = jnp.einsum("ctw,wo->cto", num_rows, pwt,
                         preferred_element_type=jnp.float32)
    den = jnp.dot(den_rows.reshape(toh, W), pwt,
                  preferred_element_type=jnp.float32)           # (toh, oW)

    # out = clamp(pool_sum(x*e_x) / pool_sum(e_x), 0, inf)
    # (the avg_pool normalisation and *(kh+kw) scale factors cancel exactly).
    inv = 1.0 / den                                             # one small recip
    out = jnp.maximum(num * inv[None, :, :], 0.0)
    o_ref[...] = out.astype(o_ref.dtype)


def _pair(v):
    if isinstance(v, (tuple, list)):
        return int(v[0]), int(v[1])
    return int(v), int(v)


def _pooling_matrix_t(out_size, in_size, k, s, dtype=jnp.float32):
    # (in_size, out_size): column o is 1 on input positions [o*s, o*s + k).
    i = jnp.arange(in_size)[:, None]
    o = jnp.arange(out_size)[None, :]
    return ((i >= o * s) & (i < o * s + k)).astype(dtype)


def softpool(x, kernel_size=2, stride=2, *, block_out_rows=None):
    """SoftPool forward matching the PyTorch fallback-path semantics (NCHW)."""
    kh, kw = _pair(kernel_size)
    sh, sw = (kh, kw) if stride is None else _pair(stride)

    B, C, H, W = x.shape
    oH = (H - kh) // sh + 1
    oW = (W - kw) // sw + 1

    # ---- choose an H tile (output rows per grid step) ----
    # Tiling is legal when pooling windows never cross a tile boundary, i.e.
    # sh >= kh (true for the default k == s).  toh is kept a multiple of 8 so
    # the in-kernel reshapes are layout-free.
    if block_out_rows is not None:
        toh = int(block_out_rows)            # test hook / manual override
    elif sh >= kh and oH > 8:
        budget = 4 << 20                     # ~4 MiB f32 (C, toh, W) slab
        toh = budget // max(1, C * W * 4)
        toh = (min(oH, toh) // 8) * 8
        toh = max(8, toh)
    else:
        toh = oH                             # single tile over H
    toh = min(toh, oH)
    n_h = int(pl.cdiv(oH, toh))
    bH = toh * sh if n_h > 1 else H
    # TODO(synk): overlapping windows (stride < kernel) with very large H are
    # not spatially tiled; they would need a halo/Element index_map.

    pwt = _pooling_matrix_t(oW, W, kw, sw)   # (W, oW) f32 0/1

    # Explicit scoped-VMEM limit: 2x in-block + 2x out-block + f32 working set.
    itemsize = jnp.dtype(x.dtype).itemsize
    in_blk = C * bH * W * itemsize
    out_blk = C * toh * oW * itemsize
    work = 3 * C * toh * W * 4 + 2 * toh * W * 4
    est = 2 * in_blk + 2 * out_blk + work + 2 * W * oW * 4 + (2 << 20)
    vmem_limit = int(min(max(est, 16 << 20), 48 << 20))

    kernel = functools.partial(_softpool_kernel, kh=kh, sh=sh, toh=toh)

    out = pl.pallas_call(
        kernel,
        out_shape=jax.ShapeDtypeStruct((B, C, oH, oW), x.dtype),
        grid_spec=pltpu.PrefetchScalarGridSpec(
            num_scalar_prefetch=0,
            grid=(B, n_h),
            in_specs=[
                # Batch dim squeezed (None) -> kernel sees (C, bH, W).
                pl.BlockSpec((None, C, bH, W), lambda b, h: (b, 0, h, 0)),
                pl.BlockSpec((W, oW), lambda b, h: (0, 0)),
            ],
            # Batch dim squeezed -> kernel sees (C, toh, oW).
            out_specs=pl.BlockSpec((None, C, toh, oW), lambda b, h: (b, 0, h, 0)),
        ),
        compiler_params=pltpu.CompilerParams(
            dimension_semantics=("parallel", "parallel"),
            vmem_limit_bytes=vmem_limit),
    )(x, pwt)
    return out


def _softpool_ref(x, kernel_size=2, stride=2):
    """Pure-JAX reference mirroring the PyTorch fallback branch."""
    kh, kw = _pair(kernel_size)
    sh, sw = (kh, kw) if stride is None else _pair(stride)

    def avg_pool(a):
        s = jax.lax.reduce_window(
            a, 0.0, jax.lax.add,
            window_dimensions=(1, 1, kh, kw),
            window_strides=(1, 1, sh, sw),
            padding="VALID")
        return s / float(kh * kw)

    e_x = jnp.sum(jnp.exp(x), axis=1, keepdims=True)
    e_x = jnp.maximum(e_x, 0.0)
    num = avg_pool(x * e_x) * float(kh + kw)
    den = avg_pool(e_x) * float(kh + kw)
    return jnp.maximum(num / den, 0.0)


if __name__ == "__main__":
    key = jax.random.PRNGKey(0)
    k1, k2 = jax.random.split(key)

    # Default path: one H tile per image.
    x1 = jax.random.normal(k1, (2, 4, 16, 16), dtype=jnp.float32)
    out1 = jax.block_until_ready(softpool(x1, kernel_size=2, stride=2))
    ref1 = _softpool_ref(x1, kernel_size=2, stride=2)
    assert out1.shape == (2, 4, 8, 8), out1.shape
    assert jnp.allclose(out1, ref1, atol=1e-5, rtol=1e-5), \
        float(jnp.max(jnp.abs(out1 - ref1)))

    # Tiled path: 2 tiles of 8 output rows (exercises the parallel H grid axis).
    x2 = jax.random.normal(k2, (1, 3, 32, 16), dtype=jnp.float32)
    out2 = jax.block_until_ready(
        softpool(x2, kernel_size=2, stride=2, block_out_rows=8))
    ref2 = _softpool_ref(x2, kernel_size=2, stride=2)
    assert out2.shape == (1, 3, 16, 8), out2.shape
    assert jnp.allclose(out2, ref2, atol=1e-5, rtol=1e-5), \
        float(jnp.max(jnp.abs(out2 - ref2)))

    print("KERNEL_OK")
</pallas_src>

<mosaic_0001>
module attributes {stable_mosaic.version = 11 : i64} {
  func.func @_softpool_kernel(%arg0: i32, %arg1: i32, %arg2: memref<1x4x16x16xf32, #tpu.memory_space<vmem>>, %arg3: memref<16x8xf32, #tpu.memory_space<vmem>>, %arg4: memref<1x4x8x8xf32, #tpu.memory_space<vmem>>) attributes {dimension_semantics = [#tpu.dimension_semantics<parallel>, #tpu.dimension_semantics<parallel>], iteration_bounds = array<i64: 2, 1>, scalar_prefetch = 0 : i64, scratch_operands = 0 : i64, tpu.core_type = #tpu.core_type<tc>, window_params = [{transform_indices = @transform_0, window_bounds = array<i64: 1, 4, 16, 16>}, {pipeline_mode = #tpu.pipeline_mode<synchronous>, transform_indices = @transform_1, window_bounds = array<i64: 16, 8>}, {transform_indices = @transform_2, window_bounds = array<i64: 1, 4, 8, 8>}]} {
    %c0 = arith.constant 0 : index
    %c0_0 = arith.constant 0 : index
    %c0_1 = arith.constant 0 : index
    %c0_2 = arith.constant 0 : index
    %0 = tpu.strided_load %arg2[%c0, %c0_0, %c0_1, %c0_2] {strides = array<i32: 1, 1, 2, 1>} : memref<1x4x16x16xf32, #tpu.memory_space<vmem>>, vector<1x4x8x16xf32>
    %1 = vector.shape_cast %0 : vector<1x4x8x16xf32> to vector<4x8x16xf32>
    %2 = math.exp %1 : vector<4x8x16xf32>
    %cst = arith.constant dense<0.000000e+00> : vector<8x16xf32>
    %3 = vector.multi_reduction <add>, %2, %cst [0] : vector<4x8x16xf32> to vector<8x16xf32>
    %4 = vector.shape_cast %3 : vector<8x16xf32> to vector<1x8x16xf32>
    %5 = vector.broadcast %4 : vector<1x8x16xf32> to vector<4x8x16xf32>
    %6 = arith.mulf %1, %5 : vector<4x8x16xf32>
    %c0_3 = arith.constant 0 : index
    %c0_4 = arith.constant 0 : index
    %c1 = arith.constant 1 : index
    %c0_5 = arith.constant 0 : index
    %7 = tpu.strided_load %arg2[%c0_3, %c0_4, %c1, %c0_5] {strides = array<i32: 1, 1, 2, 1>} : memref<1x4x16x16xf32, #tpu.memory_space<vmem>>, vector<1x4x8x16xf32>
    %8 = vector.shape_cast %7 : vector<1x4x8x16xf32> to vector<4x8x16xf32>
    %9 = math.exp %8 : vector<4x8x16xf32>
    %cst_6 = arith.constant dense<0.000000e+00> : vector<8x16xf32>
    %10 = vector.multi_reduction <add>, %9, %cst_6 [0] : vector<4x8x16xf32> to vector<8x16xf32>
    %11 = vector.shape_cast %10 : vector<8x16xf32> to vector<1x8x16xf32>
    %12 = vector.broadcast %11 : vector<1x8x16xf32> to vector<4x8x16xf32>
    %13 = arith.mulf %8, %12 : vector<4x8x16xf32>
    %14 = arith.addf %6, %13 : vector<4x8x16xf32>
    %15 = arith.addf %4, %11 : vector<1x8x16xf32>
    %c0_7 = arith.constant 0 : index
    %c0_8 = arith.constant 0 : index
    %16 = vector.load %arg3[%c0_7, %c0_8] : memref<16x8xf32, #tpu.memory_space<vmem>>, vector<16x8xf32>
    %17 = vector.shape_cast %14 : vector<4x8x16xf32> to vector<32x16xf32>
    %cst_9 = arith.constant dense<0.000000e+00> : vector<32x8xf32>
    %18 = tpu.matmul %17, %16, %cst_9 {dimension_numbers = #tpu.dot_dimension_numbers<[1], [0], [0], [1], [0, 0, 1, 1], [], []>} : vector<32x16xf32>, vector<16x8xf32>, vector<32x8xf32> -> vector<32x8xf32>
    %19 = vector.shape_cast %18 : vector<32x8xf32> to vector<4x8x8xf32>
    %20 = vector.shape_cast %15 : vector<1x8x16xf32> to vector<8x16xf32>
    %cst_10 = arith.constant dense<0.000000e+00> : vector<8x8xf32>
    %21 = tpu.matmul %20, %16, %cst_10 {dimension_numbers = #tpu.dot_dimension_numbers<[1], [0], [0], [1], [0, 0, 1, 1], [], []>} : vector<8x16xf32>, vector<16x8xf32>, vector<8x8xf32> -> vector<8x8xf32>
    %cst_11 = arith.constant 1.000000e+00 : f32
    %22 = vector.broadcast %cst_11 : f32 to vector<8x8xf32>
    %23 = arith.divf %22, %21 : vector<8x8xf32>
    %24 = vector.shape_cast %23 : vector<8x8xf32> to vector<1x8x8xf32>
    %25 = vector.broadcast %24 : vector<1x8x8xf32> to vector<4x8x8xf32>
    %26 = arith.mulf %19, %25 : vector<4x8x8xf32>
    %cst_12 = arith.constant 0.000000e+00 : f32
    %27 = vector.broadcast %cst_12 : f32 to vector<4x8x8xf32>
    %28 = arith.maximumf %26, %27 : vector<4x8x8xf32>
    %c0_13 = arith.constant 0 : index
    %c0_14 = arith.constant 0 : index
    %c0_15 = arith.constant 0 : index
    %c0_16 = arith.constant 0 : index
    %29 = vector.load %arg4[%c0_13, %c0_14, %c0_15, %c0_16] : memref<1x4x8x8xf32, #tpu.memory_space<vmem>>, vector<1x4x8x8xf32>
    %30 = vector.shape_cast %29 : vector<1x4x8x8xf32> to vector<4x8x8xf32>
    %31 = vector.shape_cast %28 : vector<4x8x8xf32> to vector<1x4x8x8xf32>
    tpu.vector_store %arg4[%c0_13, %c0_14, %c0_15, %c0_16], %31 {strides = array<i32>} : memref<1x4x8x8xf32, #tpu.memory_space<vmem>>, vector<1x4x8x8xf32>,
    return
  }
  func.func @transform_0(%arg0: i32, %arg1: i32) -> (i32, i32, i32, i32) {
    %c0_i32 = arith.constant 0 : i32
    %c0_i32_0 = arith.constant 0 : i32
    %c0_i32_1 = arith.constant 0 : i32
    return %arg0, %c0_i32, %arg1, %c0_i32_0 : i32, i32, i32, i32
  }
  func.func @transform_1(%arg0: i32, %arg1: i32) -> (i32, i32) {
    %c0_i32 = arith.constant 0 : i32
    %c0_i32_0 = arith.constant 0 : i32
    %c0_i32_1 = arith.constant 0 : i32
    return %c0_i32, %c0_i32_0 : i32, i32
  }
  func.func @transform_2(%arg0: i32, %arg1: i32) -> (i32, i32, i32, i32) {
    %c0_i32 = arith.constant 0 : i32
    %c0_i32_0 = arith.constant 0 : i32
    %c0_i32_1 = arith.constant 0 : i32
    return %arg0, %c0_i32, %arg1, %c0_i32_0 : i32, i32, i32, i32
  }
}

</mosaic_0001>

<bundles_post_ra>
// kernel: tpu_custom_call.1
= control target key start
LH: loop header
LB: loop body
LE: loop exit
PB: predicated region body
PF: predicated region fallthrough
CT: control target
= control target key end

     0   :  { %7 = vsyncpa [#allocation3], 0  ;;  %s968_s0 = inlined_call_operand.hbm [shape: f32[2,4,16,16], index: 0, kind: input, shape index: {}]   ;;  %s969_s1 = inlined_call_operand.vmem [shape: f32[16,8], index: 1, kind: input, shape index: {}]   ;;  %s970_s2 = inlined_call_operand.hbm [shape: f32[2,4,8,8], index: 2, kind: output, shape index: {}]  }
   0x1   :  { %9 = vsyncpa [#allocation3 + $0x1], 0 }
   0x2   :  { %10 = vsyncpa [#allocation4], 0 }
   0x3   :  { %12 = vsyncpa [#allocation4 + $0x1], 0  ;;  %s802_s9 = smov 0   ;;  %s804_s10 = smov 0  }
   0x4   :  { %s806_s11 = smov 0   ;;  %s808_s12 = smov 0  }
   0x5   :  { %s810_s13 = smov 0   ;;  %s812_s14 = smov 0  }
   0x6 LB: > { %s528_s15 = sadd.s32 4294967295, %s777_s14   ;;  %s529_s16 = sadd.s32 4294967294, %s777_s14   ;;  %s777_s14 = sphi %s812_s14, %s18_s14   ;;  %s773_s13 = sphi %s810_s13, %s981_s13   ;;  %s769_s12 = sphi %s808_s12, %s980_s12   ;;  %s765_s11 = sphi %s806_s11, %s979_s11   ;;  %s761_s10 = sphi %s804_s10, %s978_s10   ;;  %s757_s9 = sphi %s802_s9, %s977_s9  }
   0x7   : > { %s30_s17 = sadd.s32 1, %s773_s13  ;;  %s39_s18 = sadd.s32 1, %s765_s11 }
   0x8   : > { %p32_p0 = scmp.ge.s32.totalorder %s30_s17, 2  ;;  %p46_p1 = scmp.ne.s32.totalorder %s765_s11, %s761_s10 }
   0x9   : > { %p47_p2 = scmp.eq.s32.totalorder %s777_s14, 0  ;;  %p52_p3 = scmp.ne.s32.totalorder %s761_s10, %s757_s9 }
   0xa   : > { %s983_s17 = smov (%p32_p0, %s30_s17), 0  ;;  %p53_p5 = scmp.eq.s32.totalorder %s528_s15, 0 }
   0xb   : > { %p843_p4 = por %p47_p2, %p46_p1  ;;  %s34_s20 = ssub.s32 %s773_s13, %s983_s17 }
   0xc   : > { %p99_p6 = scmp.eq.s32.totalorder %s528_s15, 1  ;;  %p37_p7 = scmp.eq.s32.totalorder %s34_s20, 0 }
   0xd   : > { %p849_p8 = por %p53_p5, %p52_p3  ;;  %p105_p10 = scmp.eq.s32.totalorder %s529_s16, 1 }
   0xe   : > { %p853_p9 = por %p99_p6, %p46_p1  ;;  %p595_p13 = scmp.lt.s32.totalorder %s777_s14, 2 }
   0xf   : > { %s858_s23 = scalar_select %p37_p7, %s765_s11, %s39_s18  }
  0x10   : > { %p860_p11 = por %p105_p10, %p52_p3  ;;  %s128_s25 = sand.u32 1, %s765_s11  }
  0x11   : > { %s532_s26 = sshll.u32 %s128_s25, 6  ;;  %s555_s27 = sshll.u32 %s773_s13, 10 }
  0x12   : > { %s140_s30 = scalar_lea.hbm %s968_s0, %s555_s27  ;;  %s132_s3 = scalar_lea.vmem [#allocation2], %s532_s26 }
  0x13   : > { %s141_s4 = sshll.u32 %s132_s3, 4  ;;  %p873_p0 = pnand %p595_p13, %p843_p4  ;;  %s142_s4 = int_to_ptr.vmem [resolvable:$true] %s141_s4 }
  0x14   : > { %p535_p1 = scmp.ge.s32.totalorder %s777_s14, 1  ;;  %s129_s6 = scalar_lea.sflag [#allocation3], %s128_s25 }
  0x15   : > { %p671_p2 = pneg %p873_p0  ;;  %s682_s7 = scalar_lea.vmem %s142_s4, 1024 }
  0x16   : > { %p683_p3 = scmp.ne.s32.totalorder %s142_s4, %s682_s7  ;;  %s779_s8 = smov [#allocation2]  }
  0x17   : > { %s687_s15 = sshll.u32 %s779_s8, 4  ;;  %s688_s15 = int_to_ptr.vmem [resolvable:$false] %s687_s15 }
  0x18   : > { %p685_p5 = pnand %p683_p3, %p671_p2  ;;  %s689_s16 = scalar_lea.vmem %s688_s15, 2048 }
  0x19   : > { %p690_p7 = scmp.lt.s32.totalorder %s142_s4, %s688_s15  ;;  %p691_p10 = scmp.lt.s32.totalorder %s689_s16, %s682_s7 }
  0x1a   : > { %p686_p6 = pneg %p685_p5 }
  0x1b   : > { %p692_p12 = por %p691_p10, %p690_p7 }
  0x1d   : > { %p693_p4 = pnand %p692_p12, %p686_p6 }
  0x1f   : > { %696 = shalt.err (!%p693_p4)
}
  0x20   : > { %s780_s18 = smov 128   ;;  %s781_s19 = smov 8  }
  0x21   : > { %590 = dma.hbm_to_vmem [thread:$0]  (!%p873_p0), %s140_s30, 1024, %s142_s4, %s129_s6, %s780_s18, %s780_s18, %s781_s19  }
  0x22   : > { %p149_p13 = scmp.lt.s32.totalorder %s777_s14, 3 }
  0x24   : > { %p150_p2 = pnand %p535_p1, %p149_p13 }
  0x25   : > { %s886_s20 = sand.u32 (!%p150_p2), 1, %s761_s10  }
  0x26   : > { %153 = sbr.rel (%p150_p2) target bundleno = 302 (0x12e), region = 28  ;;  %s536_s25 = sshll.u32 (!%p150_p2), %s886_s20, 6 }
  0x27   : > { %s156_s26 = scalar_lea.sflag (!%p150_p2), [#allocation3], %s886_s20  ;;  %s159_s27 = scalar_lea.vmem (!%p150_p2), [#allocation2], %s536_s25 }
  0x2b   : > { %748 = dma.done.wait (%p849_p8), %s156_s26, 1024  }
  0x2c   : > { %750 = vsyncadd (%p849_p8), %s156_s26, 4294966272  ;;  %v782_v0 = vmov 0.0   ;;  %vm783_vm0 = vmmov 0   ;;  %v241_v1 = vld [vmem:[%s969_s1 + $0x8] sm:$0xff]  ;;  %v240_v2 = vld [vmem:[%s969_s1] sm:$0xff]  ;;  %vm196_vm1 = vcmask 130048  }
  0x2d   : > { %576 = vmatprep.subr.mxu1 %v782_v0  ;;  %580 = vmatprep.mubr.msk.f32.mxu1 %vm783_vm0, %v782_v0  ;;  %v181_v3 = vld [vmem:[%s159_s27] ss:$2 sm:$0xff]  ;;  %v538_v4 = vld [vmem:[%s159_s27 + $0x10] ss:$2 sm:$0xff]  ;;  %v541_v11 = vld [vmem:[%s159_s27 + $0x1] ss:$2 sm:$0xff] }
  0x2e   : > { %577 = vmatpush3.msra.mxu1 %v241_v1  ;;  %v539_v5 = vld [vmem:[%s159_s27 + $0x20] ss:$2 sm:$0xff]  ;;  %v540_v6 = vld [vmem:[%s159_s27 + $0x30] ss:$2 sm:$0xff]  ;;  %566 = vmatprep.subr.mxu0 %v241_v1  ;;  %v188_v7 = vmul.f32 1.442695, %v181_v3 }
  0x2f   : > { %578 = vmatprep.subr.mxu1 %v782_v0  ;;  %v190_v8 = vmul.f32 1.442695, %v538_v4  ;;  %v192_v9 = vmul.f32 1.442695, %v539_v5  ;;  %567 = vmatpush3.msra.mxu0 %v241_v1  ;;  %v194_v10 = vmul.f32 1.442695, %v540_v6 }
  0x30   : > { %579 = vmatpush3.msra.mxu1 %v240_v2  ;;  %v542_v12 = vld [vmem:[%s159_s27 + $0x11] ss:$2 sm:$0xff]  ;;  %568 = vmatprep.subr.mxu0 %v240_v2  ;;  %651 = vpow2.f32 %v188_v7  ;;  %v543_v13 = vld [vmem:[%s159_s27 + $0x21] ss:$2 sm:$0xff]  ;;  %v216_v15 = vmul.f32 1.442695, %v541_v11 }
  0x31   : > { %v544_v14 = vld [vmem:[%s159_s27 + $0x31] ss:$2 sm:$0xff]  ;;  %569 = vmatpush3.msra.mxu0 %v240_v2  ;;  %653 = vpow2.f32 %v190_v8  ;;  %v218_v16 = vmul.f32 1.442695, %v542_v12  ;;  %v220_v17 = vmul.f32 1.442695, %v543_v13 }
  0x32   : > { %655 = vpow2.f32 %v192_v9  ;;  %v222_v18 = vmul.f32 1.442695, %v544_v14  ;;  %s537_s21 = sshll.u32 %s886_s20, 5  ;;  %s556_s6 = sshll.u32 %s769_s12, 9  ;;  %vm422_vm2 = vcmask 64512  }
  0x33   : > { %657 = vpow2.f32 %v194_v10  ;;  %s179_s4 = scalar_lea.vmem [#allocation5], %s537_s21  ;;  %s920_s15 = scalar_lea.hbm %s970_s2, %s556_s6 }
  0x34   : > { %659 = vpow2.f32 %v216_v15  ;;  %s442_s5 = sshll.u32 %s179_s4, 4  ;;  %s428_s12 = scalar_lea.sflag [#allocation4], %s886_s20  ;;  %s915_s5 = int_to_ptr.vmem [resolvable:$true] %s442_s5 }
  0x35   : > { %661 = vpow2.f32 %v218_v16  ;;  %s697_s16 = scalar_lea.vmem %s915_s5, 512  ;;  %s784_s18 = smov [#allocation5]  }
  0x36   : > { %663 = vpow2.f32 %v220_v17  ;;  %p698_p8 = scmp.ne.s32.totalorder %s915_s5, %s697_s16  ;;  %s701_s19 = sshll.u32 %s784_s18, 4  ;;  %s702_s19 = int_to_ptr.vmem [resolvable:$false] %s701_s19 }
  0x37   : > { %665 = vpow2.f32 %v222_v18  ;;  %s703_s25 = scalar_lea.vmem %s702_s19, 1024  ;;  %p704_p1 = scmp.lt.s32.totalorder %s915_s5, %s702_s19 }
  0x38   : > { %p699_p12 = pnand %p698_p8, %p853_p9  ;;  %p705_p3 = scmp.lt.s32.totalorder %s703_s25, %s697_s16 }
  0x3a   : > { %p700_p0 = pneg %p699_p12  ;;  %p706_p5 = por %p705_p3, %p704_p1 }
  0x3c   : > { %p707_p6 = pnand %p706_p5, %p700_p0 }
  0x3d   : > { %v652_v19 = vpop.eup %651 }
  0x3e   : > { %v654_v20 = vpop.eup %653  ;;  %v197_v21 = vsel %vm196_vm1, %v652_v19, 0.0 }
  0x3f   : > { %v656_v22 = vpop.eup %655  ;;  %v198_v23 = vsel %vm196_vm1, %v654_v20, 0.0 }
  0x40   : > { %v658_v24 = vpop.eup %657  ;;  %v199_v25 = vadd.f32 %v198_v23, %v197_v21  ;;  %v200_v26 = vsel %vm196_vm1, %v656_v22, 0.0 }
  0x41   : > { %v660_v27 = vpop.eup %659  ;;  %v202_v32 = vsel %vm196_vm1, %v658_v24, 0.0 }
  0x42   : > { %v662_v28 = vpop.eup %661  ;;  %v201_v29 = vadd.f32 %v200_v26, %v199_v25  ;;  %v224_v30 = vsel %vm196_vm1, %v660_v27, 0.0 }
  0x43   : > { %v664_v31 = vpop.eup %663  ;;  %v225_v33 = vsel %vm196_vm1, %v662_v28, 0.0 }
  0x44   : > { %v666_v34 = vpop.eup %665  ;;  %v226_v35 = vadd.f32 %v225_v33, %v224_v30  ;;  %v227_v36 = vsel %vm196_vm1, %v664_v31, 0.0  ;;  %v203_v38 = vadd.f32 %v202_v32, %v201_v29 }
  0x45   : > { %v229_v37 = vsel %vm196_vm1, %v666_v34, 0.0 }
  0x46   : > { %v228_v39 = vadd.f32 %v227_v36, %v226_v35  ;;  %v204_v41 = vmul.f32 %v203_v38, %v181_v3  ;;  %v205_v42 = vmul.f32 %v538_v4, %v203_v38  ;;  %v206_v43 = vmul.f32 %v539_v5, %v203_v38 }
  0x47   : > { %v207_v48 = vmul.f32 %v540_v6, %v203_v38 }
  0x48   : > { %v230_v40 = vadd.f32 %v229_v37, %v228_v39 }
  0x4a   : > { %v239_v44 = vadd.f32 %v230_v40, %v203_v38  ;;  %v231_v45 = vmul.f32 %v541_v11, %v230_v40  ;;  %v232_v46 = vmul.f32 %v542_v12, %v230_v40  ;;  %v233_v47 = vmul.f32 %v543_v13, %v230_v40 }
  0x4b   : > { %v234_v49 = vmul.f32 %v544_v14, %v230_v40 }
  0x4c   : > { %581 = vmatmul.mubr.msk.f32.vlgmr.msra.gmra.mxu1 %vm196_vm1, %v239_v44  ;;  %v235_v50 = vadd.f32 %v231_v45, %v204_v41  ;;  %v236_v51 = vadd.f32 %v232_v46, %v205_v42  ;;  %v237_v52 = vadd.f32 %v233_v47, %v206_v43 }
  0x4d   : > { %v238_v53 = vadd.f32 %v234_v49, %v207_v48 }
  0x4e   : > { %570 = vmatprep.mubr.msk.f32.mxu0 %vm196_vm1, %v235_v50 }
  0x4f   : > { %571 = vmatmul.mubr.msk.f32.vlgmr.msra.gmra.mxu0 %vm196_vm1, %v236_v51 }
  0x50   : > { %573 = vmatprep.mubr.msk.f32.mxu0 %vm196_vm1, %v237_v52 }
  0x53   : > { %574 = vmatmul.mubr.msk.f32.gmra.mxu0 %vm196_vm1, %v238_v53 }
 0x10c   : > { %v408_v54 = vpop.f32.mrf.mxu1 }
 0x10d   : > { %667 = vrcp.f32 %v408_v54 }
 0x10e   : > { %v582_v55 = vpop.f32.mrf.mxu1 }
 0x10f   : > { %v572_v56 = vpop.f32.mrf.mxu0 }
 0x111   : > { %v320_v57 = vpop.f32.mrf.mxu0 }
 0x113   : > { %v575_v58 = vpop.f32.mrf.mxu0 }
 0x115   : > { %v330_v60 = vpop.f32.mrf.mxu0 }
 0x11a   : > { %v668_v59 = vpop.eup %667 }
 0x11b   : > { %v415_v61 = vmul.f32 %v668_v59, %v572_v56  ;;  %v414_v62 = vmul.f32 %v668_v59, %v320_v57  ;;  %v417_v63 = vmul.f32 %v668_v59, %v575_v58  ;;  %v416_v0 = vmul.f32 %v668_v59, %v330_v60 }
 0x11d   : > { %v419_v1 = vmax.f32 %v415_v61, 0.0  ;;  %v418_v2 = vmax.f32 %v414_v62, 0.0  ;;  %v421_v3 = vmax.f32 %v417_v63, 0.0  ;;  %v420_v4 = vmax.f32 %v416_v0, 0.0 }
 0x11f   : > { %424 = vst.msk [vmem:[%s179_s4 + $0x8] sm:$0xff] %vm422_vm2, %v419_v1  ;;  %423 = vst.msk [vmem:[%s179_s4] sm:$0xff] %vm422_vm2, %v418_v2 }
 0x120   : > { %426 = vst.msk [vmem:[%s179_s4 + $0x18] sm:$0xff] %vm422_vm2, %v421_v3  ;;  %425 = vst.msk [vmem:[%s179_s4 + $0x10] sm:$0xff] %vm422_vm2, %v420_v4 }
 0x121   : > { %710 = shalt.err (!%p707_p6)
}
 0x122   : > { %s711_s26 = scalar_lea.hbm %s920_s15, 512  ;;  %s715_s29 = scalar_lea.hbm %s970_s2, 1024 }
 0x123   : > { %p712_p7 = scmp.ne.s32.totalorder %s920_s15, %s711_s26  ;;  %p716_p13 = scmp.lt.s32.totalorder %s920_s15, %s970_s2 }
 0x124   : > { %p717_p2 = scmp.lt.s32.totalorder %s715_s29, %s711_s26 }
 0x125   : > { %p713_p10 = pnand %p712_p7, %p853_p9 }
 0x126   : > { %p718_p8 = por %p717_p2, %p716_p13 }
 0x127   : > { %p714_p4 = pneg %p713_p10 }
 0x129   : > { %p719_p12 = pnand %p718_p8, %p714_p4 }
 0x12b   : > { %722 = shalt.err (!%p719_p12)
}
 0x12c   : > { %s785_s21 = smov 128   ;;  %s786_s4 = smov 8  }
 0x12d   : > { %585 = dma.vmem_to_hbm [thread:$0]  (%p853_p9), %s915_s5, 512, %s920_s15, %s428_s12, %s785_s21, %s785_s21, %s786_s4  }
 0x12e PF: > { %s457_s6 = sand.u32 1, %s757_s9   ;;  %p976_p0 = scmp.ge.s32.totalorder %s777_s14, 2 }
 0x12f   : > { %s458_s7 = scalar_lea.sflag [#allocation4], %s457_s6 }
 0x130   : > { %p592_p1 = pnand %p976_p0, %p860_p11 }
 0x132   : > { %p593_p3 = pneg %p592_p1 }
 0x134   : > { %752 = dma.done.wait (%p593_p3), %s458_s7, 512  }
 0x135   : > { %754 = vsyncadd (%p593_p3), %s458_s7, 4294966784  ;;  %s18_s14 = sadd.s32 1, %s777_s14   ;;  %s977_s9 = smov %s761_s10 }
 0x136   : > { %p15_p5 = scmp.ge.s32.totalorder %s18_s14, 4   ;;  %s978_s10 = smov %s765_s11 }
 0x137   : > { %s979_s11 = smov %s858_s23  ;;  %s980_s12 = smov %s773_s13 }
 0x138   : > { %s981_s13 = smov %s983_s17  ;;  %17 = sbr.rel (!%p15_p5) target bundleno = 6 (0x6), region = 80 }
 0x13d   :  { %463 = vsyncpa [#allocation3], 1 }
 0x13e   :  { %465 = vsyncpa [#allocation3 + $0x1], 1 }
 0x13f   :  { %466 = vsyncpa [#allocation4], 1 }
 0x140   :  { %468 = vsyncpa [#allocation4 + $0x1], 1 }

</bundles_post_ra>
